<compile_context>
chip_gen: v6e
topology: v6e:2x2x1
jax: 0.10.0
libtpu: 0.0.40
codegen_flags: <defaults>
</compile_context>

<pallas_src>
import functools

import jax
import jax.numpy as jnp
from jax.experimental import pallas as pl
from jax.experimental.pallas import tpu as pltpu

_PAD = 2  # structural zero rows per sequence side (k=5 conv needs +-2 taps)


def _round_up(n, m):
    return ((n + m - 1) // m) * m


def _fusion_kernel(t_valid, x_ref, wA_ref, bA_ref, w32_ref, b32_ref,
                   w11_ref, b11_ref, o_ref):
    """One grid step = BB padded sequences, M = BB * Tp rows.

    x_ref   : (BB, Tp, C_in)        per-sequence zero-padded input (cdt)
    wA_ref  : (5*C_in, C_out+C_in)  fused [conv1d_5 | conv1d_3_1]   (cdt)
    bA_ref  : (1, C_out+C_in)       fused biases (f32)
    w32_ref : (3*C_in, C_out)       conv1d_3_2                      (cdt)
    b32_ref : (1, C_out)            (f32)
    w11_ref : (2*C_out, N_pad)      conv1x1, eval-BN folded, lane-padded (cdt)
    b11_ref : (1, N_pad)            (f32)
    o_ref   : (BB*Tp, N_pad)        lane-dense output block
    """
    bb, tp, c_in = x_ref.shape
    m = bb * tp
    c_out = w32_ref.shape[-1]
    cdt = wA_ref.dtype

    # Stay in the MXU operand dtype (bf16 on v6e/v7x) for the whole tap /
    # elementwise path: no f32 upcast of x, no per-matmul casts.
    x = x_ref[...].reshape(m, c_in)

    def taps(v, offsets):
        # Structural per-sequence zero padding (done in the wrapper) makes
        # every conv tap a pure shifted slice: no compare/select masks.  The
        # 8-row zero pads only keep the +-2 shifts in-bounds for the first /
        # last (discarded) padding rows of the block.
        pad = jnp.zeros((8, v.shape[-1]), v.dtype)
        vp = jnp.concatenate([pad, v, pad], axis=0)
        return jnp.concatenate([vp[8 + d:8 + d + m, :] for d in offsets],
                               axis=-1)

    # ---- fused conv1d_5 + conv1d_3_1 (+bias, +ReLU): one K=5*C_in matmul ----
    x5 = taps(x, (-2, -1, 0, 1, 2))                              # (M, 5*C_in)
    zA = jnp.dot(x5, wA_ref[...],
                 preferred_element_type=jnp.float32) + bA_ref[...]
    zA = jnp.maximum(zA, 0.0)
    y1 = zA[:, :c_out]                                           # relu(conv1d_5)

    # conv1d_3_2 zero-pads *h* (produced in-kernel), so h must be zeroed on the
    # inter-sequence padding rows: the single residual select in the kernel.
    rmod = jax.lax.broadcasted_iota(jnp.int32, (m, c_in), 0) % tp
    valid = (rmod >= _PAD) & (rmod < _PAD + t_valid)
    h = jnp.where(valid, zA[:, c_out:], 0.0).astype(cdt)         # relu(conv1d_3_1)

    # ---- conv1d_3_2 on h (+bias, +ReLU): one K=3*C_in matmul ----------------
    h3 = taps(h, (-1, 0, 1))                                     # (M, 3*C_in)
    y2 = jnp.maximum(
        jnp.dot(h3, w32_ref[...],
                preferred_element_type=jnp.float32) + b32_ref[...], 0.0)

    # ---- conv1x1 over concat([y1, y2]) with eval-BatchNorm folded -----------
    cat = jnp.concatenate([y1, y2], axis=-1).astype(cdt)         # (M, 2*C_out)
    z = jnp.dot(cat, w11_ref[...],
                preferred_element_type=jnp.float32) + b11_ref[...]
    o_ref[...] = z.astype(o_ref.dtype)                           # full-lane store


def _pick_bb(batch, tp, rows_per_step):
    """Sequences per grid step: big M, >=2 steps when possible, minimal padding."""
    bb = max(1, rows_per_step // tp)
    if batch >= 2:
        bb = min(bb, (batch + 1) // 2)      # >=2 grid steps (v7x has 2 TCs)
    bb = max(1, min(bb, batch))
    # Prefer an exact divisor of `batch` near the target (no batch padding);
    # otherwise keep the target and zero-pad the batch in the wrapper.
    for cand in range(bb, 0, -1):
        if batch % cand == 0 and cand * 2 >= bb:
            return cand
    return bb


def conv_feature_fusion(pose, rgb, params, *, use_bf16=None,
                        rows_per_step=512, out_dtype=jnp.float32):
    """Pallas implementation of Conv_feature_fusion.forward (inference)."""
    (w5, b5, w31, b31, w32, b32, w11, b11,
     bn_gamma, bn_beta, bn_mean, bn_var, bn_eps) = params

    if use_bf16 is None:   # bf16 VALU/MXU on v6e/v7x; keep f32 on <= v5
        kind = jax.devices()[0].device_kind.lower()
        use_bf16 = not any(t in kind for t in ("v2", "v3", "v4", "v5"))
    cdt = jnp.bfloat16 if use_bf16 else jnp.float32

    x = jnp.concatenate([pose, rgb], axis=-1)            # (B, T, C_in)
    B, T, C_in = x.shape
    C_out = w5.shape[0]
    N_pad = max(128, _round_up(C_out, 128))              # lane-dense out width

    # ---- fold / repack weights once, outside the kernel ---------------------
    # PyTorch Conv1d weight (C_out, C_in, K) -> tap-major matmul layout
    # (K*C_in, C_out); conv1d_3_1 is zero-padded onto the +-2 taps so it fuses
    # with conv1d_5 into a single matmul.
    wA5 = jnp.transpose(w5, (2, 1, 0)).reshape(5 * C_in, C_out)
    w31_m = jnp.transpose(w31, (2, 1, 0)).reshape(3 * C_in, C_in)
    zeros_tap = jnp.zeros((C_in, C_in), w31.dtype)
    wA = jnp.concatenate(
        [wA5, jnp.concatenate([zeros_tap, w31_m, zeros_tap], axis=0)], axis=1)
    bA = jnp.concatenate([b5, b31])                       # (C_out + C_in,)

    w32_m = jnp.transpose(w32, (2, 1, 0)).reshape(3 * C_in, C_out)

    # eval-mode BatchNorm + 1x1 bias folded into the 1x1 weights, then padded
    # to N_pad columns so the kernel's output stores are unmasked/full-lane.
    bn_scale = bn_gamma / jnp.sqrt(bn_var + bn_eps)
    w11_m = jnp.transpose(w11[:, :, 0]) * bn_scale[None, :]   # (2*C_out, C_out)
    b11_f = b11 * bn_scale + (bn_beta - bn_mean * bn_scale)
    w11_p = jnp.pad(w11_m, ((0, 0), (0, N_pad - C_out)))
    b11_p = jnp.pad(b11_f, (0, N_pad - C_out))

    # ---- structural zero padding + tiling ------------------------------------
    Tp = _round_up(T + 2 * _PAD, 8)           # >=2 zero rows each side, 8-aligned
    BB = _pick_bb(B, Tp, rows_per_step)
    B_pad = _round_up(B, BB)
    x_pad = jnp.pad(x, ((0, B_pad - B), (_PAD, Tp - T - _PAD), (0, 0)))
    M = BB * Tp
    grid = (B_pad // BB,)

    row = lambda v: v.reshape(1, -1).astype(jnp.float32)
    full = lambda arr: pl.BlockSpec(arr.shape, lambda b: (0,) * arr.ndim)

    args = (x_pad.astype(cdt), wA.astype(cdt), row(bA), w32_m.astype(cdt),
            row(b32), w11_p.astype(cdt), row(b11_p))

    out = pl.pallas_call(
        functools.partial(_fusion_kernel, T),
        out_shape=jax.ShapeDtypeStruct((B_pad * Tp, N_pad), out_dtype),
        grid=grid,
        in_specs=[
            pl.BlockSpec((BB, Tp, C_in), lambda b: (b, 0, 0)),   # x block
            full(args[1]),    # wA  (fused conv1d_5 | conv1d_3_1)
            full(args[2]),    # bA
            full(args[3]),    # w32
            full(args[4]),    # b32
            full(args[5]),    # w11 (BN folded, lane-padded)
            full(args[6]),    # b11 (BN folded, lane-padded)
        ],
        out_specs=pl.BlockSpec((M, N_pad), lambda b: (b, 0)),
        compiler_params=pltpu.CompilerParams(
            dimension_semantics=("parallel",)),
    )(*args)

    # drop structural padding rows / padded batch elements / padded lanes
    out = out.reshape(B_pad, Tp, N_pad)[:B, _PAD:_PAD + T, :C_out]
    return out


# ----------------------------- reference (plain JAX) -------------------------
def _ref_forward(pose, rgb, params):
    (w5, b5, w31, b31, w32, b32, w11, b11,
     bn_gamma, bn_beta, bn_mean, bn_var, bn_eps) = params

    def conv1d(x_ncw, w, b, pad):
        y = jax.lax.conv_general_dilated(
            x_ncw, w, window_strides=(1,), padding=[(pad, pad)],
            dimension_numbers=("NCH", "OIH", "NCH"))
        return y + b[None, :, None]

    x = jnp.concatenate([pose, rgb], axis=-1).transpose(0, 2, 1)   # (B, C_in, T)
    y1 = jax.nn.relu(conv1d(x, w5, b5, 2))
    h = jax.nn.relu(conv1d(x, w31, b31, 1))
    y2 = jax.nn.relu(conv1d(h, w32, b32, 1))
    cat = jnp.concatenate([y1, y2], axis=1)
    z = conv1d(cat, w11, b11, 0)
    z = ((z - bn_mean[None, :, None]) / jnp.sqrt(bn_var + bn_eps)[None, :, None]
         * bn_gamma[None, :, None] + bn_beta[None, :, None])
    return z.transpose(0, 2, 1)


# ----------------------------------- main ------------------------------------
if __name__ == "__main__":
    B, T = 2, 16
    F_pose, F_rgb = 12, 20
    C_in = F_pose + F_rgb      # input_channel = 32
    C_out = 32                 # output_channel

    key = jax.random.PRNGKey(0)
    ks = jax.random.split(key, 16)
    rnd = lambda k, shape, s=0.1: (s * jax.random.normal(k, shape)).astype(jnp.float32)

    pose = rnd(ks[0], (B, T, F_pose), 1.0)
    rgb = rnd(ks[1], (B, T, F_rgb), 1.0)

    # deterministic synthetic parameters (PyTorch Conv1d weight layout: O, I, K)
    params = (
        rnd(ks[2], (C_out, C_in, 5)), rnd(ks[3], (C_out,)),          # conv1d_5
        rnd(ks[4], (C_in, C_in, 3)), rnd(ks[5], (C_in,)),            # conv1d_3_1
        rnd(ks[6], (C_out, C_in, 3)), rnd(ks[7], (C_out,)),          # conv1d_3_2
        rnd(ks[8], (C_out, 2 * C_out, 1)), rnd(ks[9], (C_out,)),     # conv1x1
        1.0 + rnd(ks[10], (C_out,)),                                 # bn gamma
        rnd(ks[11], (C_out,)),                                       # bn beta
        rnd(ks[12], (C_out,)),                                       # bn running_mean
        1.0 + jnp.abs(rnd(ks[13], (C_out,))),                        # bn running_var
        1e-5,                                                        # bn eps
    )

    ref = jax.block_until_ready(_ref_forward(pose, rgb, params))

    # f32 MXU operands: tight check against the reference.
    out = jax.block_until_ready(
        conv_feature_fusion(pose, rgb, params, use_bf16=False))
    assert out.shape == (B, T, C_out), out.shape
    assert jnp.allclose(out, ref, atol=1e-3, rtol=1e-3), \
        float(jnp.max(jnp.abs(out - ref)))

    # bf16 tap/MXU path (v6e/v7x default): check against a bf16-rounded
    # reference with a tolerance tied to bf16 operand rounding, not 1e-1.
    r16 = lambda a: a.astype(jnp.bfloat16).astype(jnp.float32)
    params16 = (r16(params[0]), params[1], r16(params[2]), params[3],
                r16(params[4]), params[5], r16(params[6]), params[7],
                *params[8:])
    ref16 = jax.block_until_ready(_ref_forward(r16(pose), r16(rgb), params16))
    out16 = jax.block_until_ready(
        conv_feature_fusion(pose, rgb, params, use_bf16=True))
    assert out16.shape == (B, T, C_out), out16.shape
    assert jnp.allclose(out16, ref16, atol=3e-2, rtol=3e-2), \
        float(jnp.max(jnp.abs(out16 - ref16)))

    # multi-sequence blocks + non-divisible batch (exercises BB>1, batch pad).
    B2 = 5
    pose2 = rnd(ks[14], (B2, T, F_pose), 1.0)
    rgb2 = rnd(ks[15], (B2, T, F_rgb), 1.0)
    ref2 = jax.block_until_ready(_ref_forward(pose2, rgb2, params))
    out2 = jax.block_until_ready(
        conv_feature_fusion(pose2, rgb2, params, use_bf16=False))
    assert out2.shape == (B2, T, C_out), out2.shape
    assert jnp.allclose(out2, ref2, atol=1e-3, rtol=1e-3), \
        float(jnp.max(jnp.abs(out2 - ref2)))

    print("KERNEL_OK")
</pallas_src>

<mosaic_0001>
module attributes {stable_mosaic.version = 11 : i64} {
  func.func @_fusion_kernel(%arg0: i32, %arg1: memref<1x24x32xf32, #tpu.memory_space<vmem>>, %arg2: memref<160x64xf32, #tpu.memory_space<vmem>>, %arg3: memref<1x64xf32, #tpu.memory_space<vmem>>, %arg4: memref<96x32xf32, #tpu.memory_space<vmem>>, %arg5: memref<1x32xf32, #tpu.memory_space<vmem>>, %arg6: memref<64x128xf32, #tpu.memory_space<vmem>>, %arg7: memref<1x128xf32, #tpu.memory_space<vmem>>, %arg8: memref<24x128xf32, #tpu.memory_space<vmem>>) attributes {dimension_semantics = [#tpu.dimension_semantics<parallel>], iteration_bounds = array<i64: 2>, scalar_prefetch = 0 : i64, scratch_operands = 0 : i64, tpu.core_type = #tpu.core_type<tc>, window_params = [{transform_indices = @transform_0, window_bounds = array<i64: 1, 24, 32>}, {pipeline_mode = #tpu.pipeline_mode<synchronous>, transform_indices = @transform_1, window_bounds = array<i64: 160, 64>}, {pipeline_mode = #tpu.pipeline_mode<synchronous>, transform_indices = @transform_2, window_bounds = array<i64: 1, 64>}, {pipeline_mode = #tpu.pipeline_mode<synchronous>, transform_indices = @transform_3, window_bounds = array<i64: 96, 32>}, {pipeline_mode = #tpu.pipeline_mode<synchronous>, transform_indices = @transform_4, window_bounds = array<i64: 1, 32>}, {pipeline_mode = #tpu.pipeline_mode<synchronous>, transform_indices = @transform_5, window_bounds = array<i64: 64, 128>}, {pipeline_mode = #tpu.pipeline_mode<synchronous>, transform_indices = @transform_6, window_bounds = array<i64: 1, 128>}, {transform_indices = @transform_7, window_bounds = array<i64: 24, 128>}]} {
    %c0 = arith.constant 0 : index
    %c0_0 = arith.constant 0 : index
    %c0_1 = arith.constant 0 : index
    %0 = vector.load %arg1[%c0, %c0_0, %c0_1] : memref<1x24x32xf32, #tpu.memory_space<vmem>>, vector<1x24x32xf32>
    %1 = vector.shape_cast %0 : vector<1x24x32xf32> to vector<24x32xf32>
    %cst = arith.constant 0.000000e+00 : f32
    %2 = vector.broadcast %cst : f32 to vector<8x32xf32>
    %3 = tpu.concatenate %2, %1, %2 in 0 : vector<8x32xf32>, vector<24x32xf32>, vector<8x32xf32> -> vector<40x32xf32>
    %4 = vector.extract_strided_slice %3 {offsets = [6, 0], sizes = [24, 32], strides = [1, 1]} : vector<40x32xf32> to vector<24x32xf32>
    %5 = vector.extract_strided_slice %3 {offsets = [7, 0], sizes = [24, 32], strides = [1, 1]} : vector<40x32xf32> to vector<24x32xf32>
    %6 = vector.extract_strided_slice %3 {offsets = [8, 0], sizes = [24, 32], strides = [1, 1]} : vector<40x32xf32> to vector<24x32xf32>
    %7 = vector.extract_strided_slice %3 {offsets = [9, 0], sizes = [24, 32], strides = [1, 1]} : vector<40x32xf32> to vector<24x32xf32>
    %8 = vector.extract_strided_slice %3 {offsets = [10, 0], sizes = [24, 32], strides = [1, 1]} : vector<40x32xf32> to vector<24x32xf32>
    %9 = tpu.concatenate %4, %5, %6, %7, %8 in 1 : vector<24x32xf32>, vector<24x32xf32>, vector<24x32xf32>, vector<24x32xf32>, vector<24x32xf32> -> vector<24x160xf32>
    %c0_2 = arith.constant 0 : index
    %c0_3 = arith.constant 0 : index
    %10 = vector.load %arg2[%c0_2, %c0_3] : memref<160x64xf32, #tpu.memory_space<vmem>>, vector<160x64xf32>
    %cst_4 = arith.constant dense<0.000000e+00> : vector<24x64xf32>
    %11 = tpu.matmul %9, %10, %cst_4 {dimension_numbers = #tpu.dot_dimension_numbers<[1], [0], [0], [1], [0, 0, 1, 1], [], []>} : vector<24x160xf32>, vector<160x64xf32>, vector<24x64xf32> -> vector<24x64xf32>
    %c0_5 = arith.constant 0 : index
    %c0_6 = arith.constant 0 : index
    %12 = vector.load %arg3[%c0_5, %c0_6] : memref<1x64xf32, #tpu.memory_space<vmem>>, vector<1x64xf32>
    %13 = vector.broadcast %12 : vector<1x64xf32> to vector<24x64xf32>
    %14 = arith.addf %11, %13 : vector<24x64xf32>
    %cst_7 = arith.constant 0.000000e+00 : f32
    %15 = vector.broadcast %cst_7 : f32 to vector<24x64xf32>
    %16 = arith.maximumf %14, %15 : vector<24x64xf32>
    %17 = vector.extract_strided_slice %16 {offsets = [0, 0], sizes = [24, 32], strides = [1, 1]} : vector<24x64xf32> to vector<24x32xf32>
    %18 = tpu.iota {dimensions = array<i32: 0>} : vector<24x32xi32>
    %c24_i32 = arith.constant 24 : i32
    %c0_i32 = arith.constant 0 : i32
    %19 = arith.cmpi eq, %c24_i32, %c0_i32 : i32
    %c1_i32 = arith.constant 1 : i32
    %20 = arith.select %19, %c1_i32, %c24_i32 : i32
    %21 = vector.broadcast %20 : i32 to vector<24x32xi32>
    %22 = arith.remsi %18, %21 : vector<24x32xi32>
    %c0_i32_8 = arith.constant 0 : i32
    %23 = vector.broadcast %c0_i32_8 : i32 to vector<24x32xi32>
    %24 = arith.cmpi ne, %22, %23 : vector<24x32xi32>
    %c0_i32_9 = arith.constant 0 : i32
    %25 = vector.broadcast %c0_i32_9 : i32 to vector<24x32xi32>
    %26 = arith.cmpi slt, %22, %25 : vector<24x32xi32>
    %c0_i32_10 = arith.constant 0 : i32
    %27 = arith.cmpi slt, %20, %c0_i32_10 : i32
    %28 = vector.broadcast %27 : i1 to vector<24x32xi1>
    %29 = vector.broadcast %28 : vector<24x32xi1> to vector<24x32xi1>
    %30 = arith.xori %26, %29 : vector<24x32xi1>
    %31 = arith.andi %30, %24 : vector<24x32xi1>
    %32 = vector.broadcast %20 : i32 to vector<24x32xi32>
    %33 = arith.addi %22, %32 : vector<24x32xi32>
    %34 = arith.select %31, %33, %22 : vector<24x32xi1>, vector<24x32xi32>
    %c2_i32 = arith.constant 2 : i32
    %35 = vector.broadcast %c2_i32 : i32 to vector<24x32xi32>
    %36 = arith.cmpi sge, %34, %35 : vector<24x32xi32>
    %c18_i32 = arith.constant 18 : i32
    %37 = vector.broadcast %c18_i32 : i32 to vector<24x32xi32>
    %38 = arith.cmpi slt, %34, %37 : vector<24x32xi32>
    %39 = arith.andi %36, %38 : vector<24x32xi1>
    %40 = vector.extract_strided_slice %16 {offsets = [0, 32], sizes = [24, 32], strides = [1, 1]} : vector<24x64xf32> to vector<24x32xf32>
    %cst_11 = arith.constant 0.000000e+00 : f32
    %41 = vector.broadcast %cst_11 : f32 to vector<24x32xf32>
    %42 = arith.select %39, %40, %41 : vector<24x32xi1>, vector<24x32xf32>
    %cst_12 = arith.constant 0.000000e+00 : f32
    %43 = vector.broadcast %cst_12 : f32 to vector<8x32xf32>
    %44 = tpu.concatenate %43, %42, %43 in 0 : vector<8x32xf32>, vector<24x32xf32>, vector<8x32xf32> -> vector<40x32xf32>
    %45 = vector.extract_strided_slice %44 {offsets = [7, 0], sizes = [24, 32], strides = [1, 1]} : vector<40x32xf32> to vector<24x32xf32>
    %46 = vector.extract_strided_slice %44 {offsets = [8, 0], sizes = [24, 32], strides = [1, 1]} : vector<40x32xf32> to vector<24x32xf32>
    %47 = vector.extract_strided_slice %44 {offsets = [9, 0], sizes = [24, 32], strides = [1, 1]} : vector<40x32xf32> to vector<24x32xf32>
    %48 = tpu.concatenate %45, %46, %47 in 1 : vector<24x32xf32>, vector<24x32xf32>, vector<24x32xf32> -> vector<24x96xf32>
    %c0_13 = arith.constant 0 : index
    %c0_14 = arith.constant 0 : index
    %49 = vector.load %arg4[%c0_13, %c0_14] : memref<96x32xf32, #tpu.memory_space<vmem>>, vector<96x32xf32>
    %cst_15 = arith.constant dense<0.000000e+00> : vector<24x32xf32>
    %50 = tpu.matmul %48, %49, %cst_15 {dimension_numbers = #tpu.dot_dimension_numbers<[1], [0], [0], [1], [0, 0, 1, 1], [], []>} : vector<24x96xf32>, vector<96x32xf32>, vector<24x32xf32> -> vector<24x32xf32>
    %c0_16 = arith.constant 0 : index
    %c0_17 = arith.constant 0 : index
    %51 = vector.load %arg5[%c0_16, %c0_17] : memref<1x32xf32, #tpu.memory_space<vmem>>, vector<1x32xf32>
    %52 = vector.broadcast %51 : vector<1x32xf32> to vector<24x32xf32>
    %53 = arith.addf %50, %52 : vector<24x32xf32>
    %cst_18 = arith.constant 0.000000e+00 : f32
    %54 = vector.broadcast %cst_18 : f32 to vector<24x32xf32>
    %55 = arith.maximumf %53, %54 : vector<24x32xf32>
    %56 = tpu.concatenate %17, %55 in 1 : vector<24x32xf32>, vector<24x32xf32> -> vector<24x64xf32>
    %c0_19 = arith.constant 0 : index
    %c0_20 = arith.constant 0 : index
    %57 = vector.load %arg6[%c0_19, %c0_20] : memref<64x128xf32, #tpu.memory_space<vmem>>, vector<64x128xf32>
    %cst_21 = arith.constant dense<0.000000e+00> : vector<24x128xf32>
    %58 = tpu.matmul %56, %57, %cst_21 {dimension_numbers = #tpu.dot_dimension_numbers<[1], [0], [0], [1], [0, 0, 1, 1], [], []>} : vector<24x64xf32>, vector<64x128xf32>, vector<24x128xf32> -> vector<24x128xf32>
    %c0_22 = arith.constant 0 : index
    %c0_23 = arith.constant 0 : index
    %59 = vector.load %arg7[%c0_22, %c0_23] : memref<1x128xf32, #tpu.memory_space<vmem>>, vector<1x128xf32>
    %60 = vector.broadcast %59 : vector<1x128xf32> to vector<24x128xf32>
    %61 = arith.addf %58, %60 : vector<24x128xf32>
    %c0_24 = arith.constant 0 : index
    %c0_25 = arith.constant 0 : index
    %62 = vector.load %arg8[%c0_24, %c0_25] : memref<24x128xf32, #tpu.memory_space<vmem>>, vector<24x128xf32>
    tpu.vector_store %arg8[%c0_24, %c0_25], %61 {strides = array<i32>} : memref<24x128xf32, #tpu.memory_space<vmem>>, vector<24x128xf32>,
    return
  }
  func.func @transform_0(%arg0: i32) -> (i32, i32, i32) {
    %c0_i32 = arith.constant 0 : i32
    %c0_i32_0 = arith.constant 0 : i32
    %c0_i32_1 = arith.constant 0 : i32
    return %arg0, %c0_i32, %c0_i32_0 : i32, i32, i32
  }
  func.func @transform_1(%arg0: i32) -> (i32, i32) {
    %c0_i32 = arith.constant 0 : i32
    %c0_i32_0 = arith.constant 0 : i32
    %c0_i32_1 = arith.constant 0 : i32
    return %c0_i32, %c0_i32_0 : i32, i32
  }
  func.func @transform_2(%arg0: i32) -> (i32, i32) {
    %c0_i32 = arith.constant 0 : i32
    %c0_i32_0 = arith.constant 0 : i32
    %c0_i32_1 = arith.constant 0 : i32
    return %c0_i32, %c0_i32_0 : i32, i32
  }
  func.func @transform_3(%arg0: i32) -> (i32, i32) {
    %c0_i32 = arith.constant 0 : i32
    %c0_i32_0 = arith.constant 0 : i32
    %c0_i32_1 = arith.constant 0 : i32
    return %c0_i32, %c0_i32_0 : i32, i32
  }
  func.func @transform_4(%arg0: i32) -> (i32, i32) {
    %c0_i32 = arith.constant 0 : i32
    %c0_i32_0 = arith.constant 0 : i32
    %c0_i32_1 = arith.constant 0 : i32
    return %c0_i32, %c0_i32_0 : i32, i32
  }
  func.func @transform_5(%arg0: i32) -> (i32, i32) {
    %c0_i32 = arith.constant 0 : i32
    %c0_i32_0 = arith.constant 0 : i32
    %c0_i32_1 = arith.constant 0 : i32
    return %c0_i32, %c0_i32_0 : i32, i32
  }
  func.func @transform_6(%arg0: i32) -> (i32, i32) {
    %c0_i32 = arith.constant 0 : i32
    %c0_i32_0 = arith.constant 0 : i32
    %c0_i32_1 = arith.constant 0 : i32
    return %c0_i32, %c0_i32_0 : i32, i32
  }
  func.func @transform_7(%arg0: i32) -> (i32, i32) {
    %c0_i32 = arith.constant 0 : i32
    %c0_i32_0 = arith.constant 0 : i32
    return %arg0, %c0_i32 : i32, i32
  }
}

</mosaic_0001>

<bundles_post_ra>
// kernel: tpu_custom_call.1
= control target key start
LH: loop header
LB: loop body
LE: loop exit
PB: predicated region body
PF: predicated region fallthrough
CT: control target
= control target key end

     0   :  { %12 = vsyncpa [#allocation3], 0  ;;  %s1653_s0 = inlined_call_operand.vmem [shape: f32[2,24,32], index: 0, kind: input, shape index: {}]   ;;  %s1654_s1 = inlined_call_operand.vmem [shape: f32[160,64], index: 1, kind: input, shape index: {}]   ;;  %s1655_s2 = inlined_call_operand.vmem [shape: f32[1,64], index: 2, kind: input, shape index: {}]   ;;  %s1656_s3 = inlined_call_operand.vmem [shape: f32[96,32], index: 3, kind: input, shape index: {}]   ;;  %s1657_s4 = inlined_call_operand.vmem [shape: f32[1,32], index: 4, kind: input, shape index: {}]   ;;  %s1658_s5 = inlined_call_operand.vmem [shape: f32[64,128], index: 5, kind: input, shape index: {}]   ;;  %s1659_s6 = inlined_call_operand.vmem [shape: f32[1,128], index: 6, kind: input, shape index: {}]   ;;  %s1660_s7 = inlined_call_operand.hbm [shape: f32[48,128], index: 7, kind: output, shape index: {}]  }
   0x1   :  { %14 = vsyncpa [#allocation3 + $0x1], 0  ;;  %s1226_s24 = smov 0   ;;  %s1228_s25 = smov 0  }
   0x2   :  { %s1230_s26 = smov 0   ;;  %s1232_s27 = smov 0  }
   0x3 LB: > { %s1247_s28 = sadd.s32 4294967295, %s1176_s27   ;;  %s942_s29 = sadd.s32 4294967294, %s1176_s27   ;;  %s1176_s27 = sphi %s1232_s27, %s1666_s27   ;;  %s1172_s26 = sphi %s1230_s26, %s1665_s26   ;;  %s1168_s25 = sphi %s1228_s25, %s1664_s25   ;;  %s1164_s24 = sphi %s1226_s24, %s1663_s24  }
   0x4   : > { %s1251_s30 = sadd.s32 1, %s1176_s27   ;;  %s179_s8 = sadd.s32 1, %s1172_s26 }
   0x5   : > { %s176_s9 = ssub.s32 %s1176_s27, %s1251_s30  ;;  %p189_p0 = scmp.ne.s32.totalorder %s1172_s26, %s1168_s25 }
   0x6   : > { %p177_p1 = scmp.eq.s32.totalorder %s176_s9, 0  ;;  %p190_p2 = scmp.eq.s32.totalorder %s1247_s28, 1 }
   0x7   : > { %p195_p3 = scmp.ne.s32.totalorder %s1168_s25, %s1164_s24  ;;  %p196_p4 = scmp.eq.s32.totalorder %s942_s29, 1 }
   0x8   : > { %s1262_s10 = scalar_select %p177_p1, %s1172_s26, %s179_s8  }
   0x9   : > { %p1264_p5 = por %p190_p2, %p189_p0  ;;  %p1268_p6 = por %p196_p4, %p195_p3 }
   0xa   : > { %p945_p7 = scmp.ge.s32.totalorder %s1176_s27, 1  ;;  %p240_p8 = scmp.lt.s32.totalorder %s1176_s27, 3 }
   0xc   : > { %p241_p9 = pnand %p945_p7, %p240_p8 }
   0xd   : > { %p272_p10 = scmp.lt.s32.totalorder (!%p241_p9), %s1247_s28, 1  ;;  %s1179_s18 = smov (!%p241_p9), 32  }
   0xe   : > { %244 = sbr.rel (%p241_p9) target bundleno = 1129 (0x469), region = 48  ;;  %s1180_s19 = smov (!%p241_p9), 96  }
   0xf   : > { %s1181_s22 = smov (!%p241_p9), 64   ;;  %s962_s29 = smul.u32 (!%p241_p9), 384, %s1247_s28 }
  0x10   : > { %s1183_s14 = smov (!%p241_p9), [#allocation2]  }
  0x11   : > { %s1120_s15 = sshll.u32 (!%p241_p9), %s1183_s14, 4  ;;  %s1121_s15 = int_to_ptr.vmem [resolvable:$false] %s1120_s15 }
  0x12   : > { %s1122_s16 = scalar_lea.vmem (!%p241_p9), %s1121_s15, 768 }
  0x13   : > { %v1178_v0 = vmov 0.0   ;;  %v381_v1 = vld [vmem:[%s1654_s1 + $0x78] sm:$0xff]  ;;  %v380_v2 = vld [vmem:[%s1654_s1 + $0x70] sm:$0xff]  ;;  %s273_s17 = scalar_select %p272_p10, %s1247_s28, 1  ;;  %v379_v3 = vld [vmem:[%s1654_s1 + $0x68] sm:$0xff]  ;;  %vm285_vm0 = vcmask 1046528  }
  0x14   : > { %421 = vmatprep.subr.mxu0 %v1178_v0  ;;  %989 = vmatprep.subr.mxu1 %v1178_v0  ;;  %v378_v4 = vld [vmem:[%s1654_s1 + $0x60] sm:$0xff]  ;;  %v286_v5 = vrot.slane %v1178_v0, 1  ;;  %v377_v6 = vld [vmem:[%s1654_s1 + $0x58] sm:$0xff]  ;;  %vm323_vm1 = vcmask 1044480   ;;  %vm305_vm2 = vcmask 1045504   ;;  %v376_v16 = vld [vmem:[%s1654_s1 + $0x50] sm:$0xff] }
  0x15   : > { %422 = vmatpush1.msra.mxu0 %v381_v1  ;;  %s1048_s20 = smul.u32 24, %s273_s17  ;;  %v375_v24 = vld [vmem:[%s1654_s1 + $0x48] sm:$0xff]  ;;  %vm343_vm3 = vcmask 1043456   ;;  %v349_v32 = vrot.slane %v1178_v0, 4  ;;  %v374_v33 = vld [vmem:[%s1654_s1 + $0x40] sm:$0xff]  ;;  %vm397_vm4 = vcmask 1041408  }
  0x16   : > { %423 = vmatprep.subr.mxu0 %v1178_v0  ;;  %v373_v40 = vld [vmem:[%s1654_s1 + $0x38] sm:$0xff]  ;;  %vm351_vm5 = vcmask 261120   ;;  %v372_v47 = vld [vmem:[%s1654_s1 + $0x30] sm:$0xff]  ;;  %v329_v48 = vrot.slane %v1178_v0, 3  ;;  %v371_v49 = vld [vmem:[%s1654_s1 + $0x28] sm:$0xff]  ;;  %vm356_vm6 = vcmask 523264  }
  0x17   : > { %424 = vmatpush1.msra.mxu0 %v380_v2  ;;  %s276_s8 = scalar_lea.vmem %s1653_s0, %s1048_s20  ;;  %v370_v50 = vld [vmem:[%s1654_s1 + $0x20] sm:$0xff]  ;;  %v369_v52 = vld [vmem:[%s1654_s1 + $0x18] sm:$0xff]  ;;  %v368_v53 = vld [vmem:[%s1654_s1 + $0x10] sm:$0xff]  ;;  %vm361_vm7 = vcmask 785408  }
  0x18   : > { %425 = vmatprep.subr.mxu0 %v1178_v0  ;;  %v1299_v7 = vld [vmem:[%s276_s8] sm:$0xff]  ;;  %v1301_v8 = vld [vmem:[%s276_s8 + $0x8] sm:$0xff]  ;;  %v1303_v9 = vld [vmem:[%s276_s8 + $0x10] sm:$0xff] }
  0x19   : > { %426 = vmatpush1.msra.mxu0 %v379_v3  ;;  %v287_v10 = vrot.slane %v1299_v7, 1  ;;  %v289_v11 = vrot.slane %v1301_v8, 1  ;;  %v324_v12 = vrot.slane %v1299_v7, 3  ;;  %v325_v13 = vrot.slane %v1301_v8, 3  ;;  %v367_v54 = vld [vmem:[%s1654_s1 + $0x8] sm:$0xff]  ;;  %v366_v55 = vld [vmem:[%s1654_s1] sm:$0xff] }
  0x1a   : > { %427 = vmatprep.subr.mxu0 %v1178_v0  ;;  %v306_v14 = vrot.slane %v1299_v7, 2  ;;  %v307_v15 = vrot.slane %v1301_v8, 2  ;;  %v291_v20 = vrot.slane %v1303_v9, 1  ;;  %v344_v26 = vrot.slane %v1299_v7, 4  ;;  %v385_v56 = vld [vmem:[%s1654_s1 + $0x98] sm:$0xff]  ;;  %v384_v57 = vld [vmem:[%s1654_s1 + $0x90] sm:$0xff] }
  0x1b   : > { %428 = vmatpush1.msra.mxu0 %v378_v4  ;;  %v288_v17 = vsel %vm285_vm0, %v286_v5, %v287_v10  ;;  %v290_v18 = vsel %vm285_vm0, %v287_v10, %v289_v11  ;;  %v326_v19 = vsel %vm323_vm1, %v324_v12, %v325_v13  ;;  %v345_v27 = vrot.slane %v1301_v8, 4  ;;  %v383_v58 = vld [vmem:[%s1654_s1 + $0x88] sm:$0xff]  ;;  %v382_v59 = vld [vmem:[%s1654_s1 + $0x80] sm:$0xff] }
  0x1c   : > { %429 = vmatprep.subr.mxu0 %v1178_v0  ;;  %v1101_v21 = vpack.i.bf16 %v290_v18, %v288_v17  ;;  %v1111_v22 = vpack.i.bf16 %v326_v19, %v324_v12  ;;  %v308_v23 = vsel %vm305_vm2, %v306_v14, %v307_v15  ;;  %v347_v28 = vrot.slane %v1303_v9, 4 }
  0x1d   : > { %430 = vmatpush1.msra.mxu0 %v377_v6  ;;  %v1106_v25 = vpack.i.bf16 %v308_v23, %v306_v14  ;;  %v292_v29 = vsel %vm285_vm0, %v289_v11, %v291_v20  ;;  %v309_v30 = vrot.slane %v1303_v9, 2  ;;  %v327_v31 = vrot.slane %v1303_v9, 3 }
  0x1e   : > { %431 = vmatprep.subr.mxu0 %v1178_v0  ;;  %1102 = vrot.lane.b32.xlu0 %v1101_v21, %s1179_s18  ;;  %v346_v34 = vsel %vm343_vm3, %v344_v26, %v345_v27  ;;  %v401_v35 = vrot.slane %v344_v26, 6  ;;  %v348_v36 = vsel %vm343_vm3, %v345_v27, %v347_v28  ;;  %v350_v39 = vsel %vm343_vm3, %v347_v28, %v349_v32 }
  0x1f   : > { %432 = vmatpush1.msra.mxu0 %v376_v16  ;;  %1112 = vrot.lane.b32.xlu1 %v1111_v22, %s1180_s19  ;;  %v402_v37 = vrot.slane %v346_v34, 6  ;;  %v406_v38 = vrot.slane %v348_v36, 6  ;;  %v410_v41 = vrot.slane %v350_v39, 6  ;;  %v310_v42 = vsel %vm305_vm2, %v307_v15, %v309_v30 }
  0x20   : > { %433 = vmatprep.subr.mxu0 %v1178_v0  ;;  %v328_v43 = vsel %vm323_vm1, %v325_v13, %v327_v31  ;;  %v330_v51 = vsel %vm323_vm1, %v327_v31, %v329_v48  ;;  %v504_v32 = vlaneseq }
  0x21   : > { %434 = vmatpush1.msra.mxu0 %v375_v24  ;;  %v403_v44 = vsel %vm397_vm4, %v401_v35, %v402_v37  ;;  %v1351_v45 = vsel %vm397_vm4, %v402_v37, %v406_v38  ;;  %v1356_v46 = vsel %vm397_vm4, %v406_v38, %v410_v41 }
  0x22   : > { %435 = vmatprep.subr.mxu0 %v1178_v0  ;;  %1107 = vrot.lane.b32.xlu0 %v1106_v25, %s1181_s22 }
  0x23   : > { %297 = vrot.lane.b32.xlu1 %v292_v29, %s1179_s18  ;;  %436 = vmatpush1.msra.mxu0 %v374_v33 }
  0x24   : > { %437 = vmatprep.subr.mxu0 %v1178_v0  ;;  %948 = vmatprep.mubr.msk.f32.mxu0 %vm351_vm5, %v403_v44 }
  0x25   : > { %438 = vmatpush1.msra.mxu0 %v373_v40 }
  0x26   : > { %315 = vrot.lane.b32.xlu0 %v310_v42, %s1181_s22  ;;  %439 = vmatprep.subr.mxu0 %v1178_v0 }
  0x27   : > { %335 = vrot.lane.b32.xlu1 %v328_v43, %s1180_s19  ;;  %440 = vmatpush1.msra.mxu0 %v372_v47 }
  0x28   : > { %441 = vmatprep.subr.mxu0 %v1178_v0 }
  0x29   : > { %442 = vmatpush1.msra.mxu0 %v371_v49 }
  0x2a   : > { %299 = vrot.lane.b32.xlu0 %v291_v20, %s1179_s18  ;;  %443 = vmatprep.subr.mxu0 %v1178_v0 }
  0x2b   : > { %317 = vrot.lane.b32.xlu1 %v309_v30, %s1181_s22  ;;  %444 = vmatpush1.msra.mxu0 %v370_v50 }
  0x2c   : > { %445 = vmatprep.subr.mxu0 %v1178_v0 }
  0x2d   : > { %446 = vmatpush1.msra.mxu0 %v369_v52 }
  0x2e   : > { %337 = vrot.lane.b32.xlu0 %v330_v51, %s1180_s19  ;;  %447 = vmatprep.subr.mxu0 %v1178_v0 }
  0x2f   : > { %448 = vmatpush1.msra.mxu0 %v368_v53  ;;  %v947_v53 = vld [vmem:[%s1655_s2] ss:$0 sm:$0xff] }
  0x30   : > { %449 = vmatprep.subr.mxu0 %v1178_v0 }
  0x31   : > { %450 = vmatpush1.msra.mxu0 %v367_v54 }
  0x32   : > { %451 = vmatprep.subr.mxu0 %v1178_v0 }
  0x33   : > { %452 = vmatpush1.msra.mxu0 %v366_v55 }
  0x34   : > { %477 = vmatprep.subr.mxu0 %v1178_v0 }
  0x35   : > { %478 = vmatpush2.msra.mxu0 %v385_v56 }
  0x36   : > { %479 = vmatprep.subr.mxu0 %v1178_v0 }
  0x37   : > { %480 = vmatpush2.msra.mxu0 %v384_v57 }
  0x38   : > { %481 = vmatprep.subr.mxu0 %v1178_v0 }
  0x39   : > { %482 = vmatpush2.msra.mxu0 %v383_v58 }
  0x3a   : > { %483 = vmatprep.subr.mxu0 %v1178_v0 }
  0x3b   : > { %484 = vmatpush2.msra.mxu0 %v382_v59 }
  0x90   : > { %v1103_v60 = vpop.permute.xlu0 %1102 }
  0x91   : > { %v1113_v61 = vpop.permute.xlu1 %1112  ;;  %v1105_v62 = vunpack.i.h.bf16 %v1103_v60  ;;  %v1104_v63 = vunpack.i.l.bf16 %v1103_v60 }
  0x92   : > { %v1115_v3 = vunpack.i.h.bf16 %v1113_v61  ;;  %v1114_v11 = vunpack.i.l.bf16 %v1113_v61 }
  0x93   : > { %v353_v6 = vsel %vm351_vm5, %v1299_v7, %v1105_v62  ;;  %v352_v10 = vsel %vm351_vm5, 0.0, %v1104_v63 }
  0x94   : > { %v1108_v1 = vpop.permute.xlu0 %1107 }
  0x95   : > { %v298_v2 = vpop.permute.xlu1 %297  ;;  %v1110_v4 = vunpack.i.h.bf16 %v1108_v1  ;;  %v1109_v5 = vunpack.i.l.bf16 %v1108_v1 }
  0x96   : > { %v354_v12 = vsel %vm351_vm5, %v1301_v8, %v298_v2 }
  0x97   : > { %v357_v13 = vsel %vm356_vm6, %v352_v10, %v1109_v5  ;;  %v358_v14 = vsel %vm356_vm6, %v353_v6, %v1110_v4 }
  0x98   : > { %v316_v15 = vpop.permute.xlu0 %315  ;;  %v362_v17 = vsel %vm361_vm7, %v357_v13, %v1114_v11  ;;  %v363_v18 = vsel %vm361_vm7, %v358_v14, %v1115_v3  ;;  %v635_v11 = vld [vmem:[%s1656_s3 + $0x58] sm:$0xff]  ;;  %v633_v14 = vld [vmem:[%s1656_s3 + $0x48] sm:$0xff] }
  0x99   : > { %v336_v16 = vpop.permute.xlu1 %335  ;;  %v359_v19 = vsel %vm356_vm6, %v354_v12, %v316_v15  ;;  %v398_v20 = vrot.slane %v362_v17, 6  ;;  %v399_v7 = vrot.slane %v363_v18, 6  ;;  %v634_v12 = vld [vmem:[%s1656_s3 + $0x50] sm:$0xff]  ;;  %990 = vmatpush3.msra.mxu1 %v635_v11  ;;  %v632_v15 = vld [vmem:[%s1656_s3 + $0x40] sm:$0xff]  ;;  %v629_v18 = vld [vmem:[%s1656_s3 + $0x28] sm:$0xff] }
  0x9a   : > { %v364_v21 = vsel %vm361_vm7, %v359_v19, %v336_v16  ;;  %991 = vmatprep.subr.mxu1 %v1178_v0  ;;  %v631_v16 = vld [vmem:[%s1656_s3 + $0x38] sm:$0xff]  ;;  %v630_v17 = vld [vmem:[%s1656_s3 + $0x30] sm:$0xff]  ;;  %v628_v19 = vld [vmem:[%s1656_s3 + $0x20] sm:$0xff] }
  0x9b   : > { %v404_v22 = vrot.slane %v364_v21, 6  ;;  %v400_v23 = vsel %vm397_vm4, %v398_v20, %v399_v7  ;;  %992 = vmatpush3.msra.mxu1 %v634_v12  ;;  %v627_v20 = vld [vmem:[%s1656_s3 + $0x18] sm:$0xff]  ;;  %v625_v21 = vld [vmem:[%s1656_s3 + $0x8] sm:$0xff]  ;;  %v759_v12 = vld [vmem:[%s1658_s5] sm:$0xff] }
  0x9c   : > { %v300_v8 = vpop.permute.xlu0 %299  ;;  %486 = vmatmul.mubr.f32.vlgmr.msra.gmra.mxu0 %v400_v23  ;;  %993 = vmatprep.subr.mxu1 %v1178_v0  ;;  %v624_v23 = vld [vmem:[%s1656_s3] sm:$0xff]  ;;  %v760_v11 = vld [vmem:[%s1658_s5 + $0x8] sm:$0xff] }
  0x9d   : > { %v318_v24 = vpop.permute.xlu1 %317  ;;  %v355_v25 = vsel %vm351_vm5, %v1303_v9, %v300_v8  ;;  %949 = vmatprep.mubr.msk.f32.mxu0 %vm351_vm5, %v1351_v45  ;;  %v405_v27 = vsel %vm397_vm4, %v399_v7, %v404_v22  ;;  %v505_v9 = vshrl.u32 %v504_v32, 7  ;;  %994 = vmatpush3.msra.mxu1 %v633_v14  ;;  %v626_v7 = vld [vmem:[%s1656_s3 + $0x10] sm:$0xff] }
  0x9e   : > { %v360_v26 = vsel %vm356_vm6, %v355_v25, %v318_v24  ;;  %995 = vmatprep.subr.mxu1 %v1178_v0 }
  0x9f   : > { %v1431_v33 = vmul.u32.u64.low 2863311531, %v505_v9  ;;  %v1432_v34 = vmul.u32.u64.high 2863311531, %v505_v9, %v1431_v33  ;;  %v506_v35 = vadd.s32 8, %v505_v9  ;;  %v507_v38 = vadd.s32 16, %v505_v9  ;;  %996 = vmatpush3.msra.mxu1 %v632_v15 }
  0xa0   : > { %v338_v28 = vpop.permute.xlu0 %337  ;;  %491 = vmatmul.mubr.f32.gmra.mxu0 %v405_v27  ;;  %997 = vmatprep.subr.mxu1 %v1178_v0 }
  0xa1   : > { %v365_v29 = vsel %vm361_vm7, %v360_v26, %v338_v28  ;;  %950 = vmatprep.mubr.msk.f32.mxu0 %vm351_vm5, %v1356_v46  ;;  %v1434_v36 = vmul.u32.u64.low 2863311531, %v506_v35  ;;  %v1435_v37 = vmul.u32.u64.high 2863311531, %v506_v35, %v1434_v36  ;;  %v514_v39 = vshrl.u32 %v1432_v34, 4  ;;  %998 = vmatpush3.msra.mxu1 %v631_v16 }
  0xa2   : > { %v408_v30 = vrot.slane %v365_v29, 6  ;;  %v1438_v40 = vmul.u32.u64.low 2863311531, %v507_v38  ;;  %v1439_v41 = vmul.u32.u64.high 2863311531, %v507_v38, %v1438_v40  ;;  %999 = vmatprep.subr.mxu1 %v1178_v0  ;;  %v602_v34 = vrot.slane %v1178_v0, 2 }
  0xa3   : > { %v515_v42 = vmul.u32 24, %v514_v39  ;;  %v525_v43 = vshrl.u32 %v1435_v37, 4  ;;  %1000 = vmatpush3.msra.mxu1 %v630_v17 }
  0xa4   : > { %v409_v31 = vsel %vm397_vm4, %v404_v22, %v408_v30  ;;  %v536_v46 = vshrl.u32 %v1439_v41, 4  ;;  %1001 = vmatprep.subr.mxu1 %v1178_v0 }
  0xa5   : > { %496 = vmatmul.mubr.f32.gmra.mxu0 %v409_v31  ;;  %v516_v44 = vsub.s32 %v505_v9, %v515_v42  ;;  %v526_v45 = vmul.u32 24, %v525_v43  ;;  %1002 = vmatpush3.msra.mxu1 %v629_v18 }
  0xa6   : > { %v537_v49 = vmul.u32 24, %v536_v46  ;;  %1003 = vmatprep.subr.mxu1 %v1178_v0 }
  0xa7   : > { %vm541_vm8 = vcmp.ne.s32.totalorder %v516_v44, 0  ;;  %vm544_vm9 = vcmp.lt.s32.totalorder %v516_v44, 0  ;;  %v527_v47 = vsub.s32 %v506_v35, %v526_v45  ;;  %v550_v48 = vadd.s32 24, %v516_v44  ;;  %1004 = vmatpush3.msra.mxu1 %v628_v19 }
  0xa8   : > { %vm547_vm10 = vmand %vm544_vm9, %vm541_vm8  ;;  %v538_v51 = vsub.s32 %v507_v38, %v537_v49  ;;  %1005 = vmatprep.subr.mxu1 %v1178_v0 }
  0xa9   : > { %vm542_vm11 = vcmp.ne.s32.totalorder %v527_v47, 0  ;;  %vm545_vm12 = vcmp.lt.s32.totalorder %v527_v47, 0  ;;  %v553_v50 = vsel %vm547_vm10, %v550_v48, %v516_v44  ;;  %v551_v52 = vadd.s32 24, %v527_v47  ;;  %1006 = vmatpush3.msra.mxu1 %v627_v20 }
  0xaa   : > { %vm548_vm13 = vmand %vm545_vm12, %vm542_vm11  ;;  %vm556_vm14 = vcmp.ge.s32.totalorder %v553_v50, 2  ;;  %vm559_vm15 = vcmp.lt.s32.totalorder %v553_v50, 18  ;;  %vm543_vm1 = vcmp.ne.s32.totalorder %v538_v51, 0  ;;  %vm546_vm3 = vcmp.lt.s32.totalorder %v538_v51, 0  ;;  %1007 = vmatprep.subr.mxu1 %v1178_v0 }
  0xab   : > { %v554_v55 = vsel %vm548_vm13, %v551_v52, %v527_v47  ;;  %vm562_vm4 = vmand %vm556_vm14, %vm559_vm15  ;;  %v552_v57 = vadd.s32 24, %v538_v51  ;;  %1008 = vmatpush3.msra.mxu1 %v626_v7  ;;  %vm1182_vm15 = vmmov 0  }
  0xac   : > { %vm549_vm8 = vmand %vm546_vm3, %vm543_vm1  ;;  %vm557_vm9 = vcmp.ge.s32.totalorder %v554_v55, 2  ;;  %vm560_vm10 = vcmp.lt.s32.totalorder %v554_v55, 18  ;;  %1009 = vmatprep.subr.mxu1 %v1178_v0  ;;  %1013 = vmatprep.mubr.msk.f32.mxu1 %vm1182_vm15, %v1178_v0 }
  0xad   : > { %v555_v63 = vsel %vm549_vm8, %v552_v57, %v538_v51  ;;  %vm563_vm11 = vmand %vm557_vm9, %vm560_vm10  ;;  %1010 = vmatpush3.msra.mxu1 %v625_v21 }
  0xae   : > { %vm558_vm12 = vcmp.ge.s32.totalorder %v555_v63, 2  ;;  %vm561_vm13 = vcmp.lt.s32.totalorder %v555_v63, 18  ;;  %1011 = vmatprep.subr.mxu1 %v1178_v0  ;;  %v765_v63 = vld [vmem:[%s1658_s5 + $0x30] sm:$0xff] }
  0xaf   : > { %vm564_vm14 = vmand %vm558_vm12, %vm561_vm13  ;;  %1012 = vmatpush3.msra.mxu1 %v624_v23 }
  0xb0   : > { %1022 = vmatprep.subr.mxu1 %v1178_v0 }
 0x15c   : > { %v487_v54 = vpop.f32.mrf.mxu0 }
 0x15d   : > { %v1446_v56 = vadd.f32 %v947_v53, %v487_v54 }
 0x15e   : > { %v489_v58 = vpop.f32.mrf.mxu0 }
 0x15f   : > { %v501_v59 = vmax.f32 %v1446_v56, 0.0 }
 0x160   : > { %v492_v60 = vpop.f32.mrf.mxu0 }
 0x161   : > { %v1449_v61 = vadd.f32 %v947_v53, %v492_v60  ;;  %v565_v62 = vsel %vm562_vm4, %v501_v59, 0.0 }
 0x162   : > { %v494_v1 = vpop.f32.mrf.mxu0  ;;  %571 = vrot.lane.b32.xlu1 %v565_v62, %s1180_s19  ;;  %v766_v62 = vld [vmem:[%s1658_s5 + $0x38] sm:$0xff] }
 0x163   : > { %v502_v2 = vmax.f32 %v1449_v61, 0.0  ;;  %v764_v1 = vld [vmem:[%s1658_s5 + $0x28] sm:$0xff] }
 0x165   : > { %v497_v3 = vpop.f32.mrf.mxu0  ;;  %v566_v4 = vsel %vm563_vm11, %v502_v2, 0.0 }
 0x166   : > { %v1457_v5 = vadd.f32 %v947_v53, %v497_v3  ;;  %573 = vrot.lane.b32.xlu0 %v566_v4, %s1180_s19  ;;  %v763_v3 = vld [vmem:[%s1658_s5 + $0x20] sm:$0xff]  ;;  %v762_v4 = vld [vmem:[%s1658_s5 + $0x18] sm:$0xff] }
 0x167   : > { %v499_v6 = vpop.f32.mrf.mxu0 }
 0x168   : > { %v503_v10 = vmax.f32 %v1457_v5, 0.0  ;;  %v761_v6 = vld [vmem:[%s1658_s5 + $0x10] sm:$0xff] }
 0x16a   : > { %v567_v13 = vsel %vm564_vm14, %v503_v10, 0.0 }
 0x16b   : > { %575 = vrot.lane.b32.xlu1 %v567_v13, %s1180_s19  ;;  %v951_v13 = vld [vmem:[%s1657_s4] ss:$0 sm:$0xff] }
 0x1d4   : > { %v572_v22 = vpop.permute.xlu1 %571 }
 0x1d5   : > { %v580_v8 = vrot.slane %v572_v22, 1  ;;  %v597_v25 = vrot.slane %v572_v22, 2 }
 0x1d7   : > { %585 = vrot.lane.b32.xlu0 %v580_v8, %s1179_s18 }
 0x1d8   : > { %v574_v24 = vpop.permute.xlu0 %573 }
 0x1d9   : > { %v581_v26 = vrot.slane %v574_v24, 1  ;;  %v598_v27 = vrot.slane %v574_v24, 2 }
 0x1db   : > { %604 = vrot.lane.b32.xlu0 %v597_v25, %s1181_s22  ;;  %v582_v28 = vsel %vm285_vm0, %v580_v8, %v581_v26  ;;  %v599_v32 = vsel %vm305_vm2, %v597_v25, %v598_v27 }
 0x1dc   : > { %587 = vrot.lane.b32.xlu1 %v582_v28, %s1179_s18 }
 0x1dd   : > { %v576_v29 = vpop.permute.xlu1 %575 }
 0x1de   : > { %v583_v30 = vrot.slane %v576_v29, 1  ;;  %v600_v31 = vrot.slane %v576_v29, 2 }
 0x1e0   : > { %606 = vrot.lane.b32.xlu1 %v599_v32, %s1181_s22  ;;  %v584_v9 = vsel %vm285_vm0, %v581_v26, %v583_v30  ;;  %v601_v33 = vsel %vm305_vm2, %v598_v27, %v600_v31  ;;  %v603_v35 = vsel %vm305_vm2, %v600_v31, %v602_v34  ;;  %vm647_vm0 = vcmask 1040384  }
 0x1e1   : > { %589 = vrot.lane.b32.xlu0 %v584_v9, %s1179_s18 }
 0x1e4   : > { %608 = vrot.lane.b32.xlu1 %v601_v33, %s1181_s22 }
 0x1e5   : > { %591 = vrot.lane.b32.xlu0 %v583_v30, %s1179_s18 }
 0x1e8   : > { %610 = vrot.lane.b32.xlu1 %v603_v35, %s1181_s22  ;;  %s1611_s22 = scalar_lea.hbm %s1660_s7, %s962_s29 }
 0x249   : > { %v586_v36 = vpop.permute.xlu0 %585 }
 0x24a   : > { %v616_v39 = vsel %vm351_vm5, 0.0, %v586_v36 }
 0x24d   : > { %v605_v37 = vpop.permute.xlu0 %604 }
 0x24e   : > { %v588_v38 = vpop.permute.xlu1 %587  ;;  %v620_v40 = vsel %vm356_vm6, %v616_v39, %v605_v37 }
 0x24f   : > { %v617_v41 = vsel %vm351_vm5, %v572_v22, %v588_v38  ;;  %v648_v45 = vrot.slane %v620_v40, 7 }
 0x252   : > { %v607_v42 = vpop.permute.xlu1 %606 }
 0x253   : > { %v621_v43 = vsel %vm356_vm6, %v617_v41, %v607_v42  ;;  %v590_v44 = vpop.permute.xlu0 %589 }
 0x254   : > { %v649_v46 = vrot.slane %v621_v43, 7  ;;  %v618_v47 = vsel %vm351_vm5, %v574_v24, %v590_v44 }
 0x256   : > { %v609_v48 = vpop.permute.xlu1 %608  ;;  %v650_v49 = vsel %vm647_vm0, %v648_v45, %v649_v46 }
 0x257   : > { %v622_v50 = vsel %vm356_vm6, %v618_v47, %v609_v48  ;;  %v592_v51 = vpop.permute.xlu0 %591  ;;  %1014 = vmatmul.mubr.msk.f32.vlgmr.msra.gmra.mxu1 %vm361_vm7, %v650_v49 }
 0x258   : > { %v651_v52 = vrot.slane %v622_v50, 7  ;;  %1016 = vmatprep.mubr.msk.f32.mxu1 %vm1182_vm15, %v1178_v0  ;;  %v619_v53 = vsel %vm351_vm5, %v576_v29, %v592_v51  ;;  %1023 = vmatpush3.msra.mxu1 %v766_v62 }
 0x259   : > { %1024 = vmatprep.subr.mxu1 %v1178_v0 }
 0x25a   : > { %v611_v54 = vpop.permute.xlu1 %610  ;;  %v652_v55 = vsel %vm647_vm0, %v649_v46, %v651_v52  ;;  %1025 = vmatpush3.msra.mxu1 %v765_v63 }
 0x25b   : > { %v623_v57 = vsel %vm356_vm6, %v619_v53, %v611_v54  ;;  %1017 = vmatmul.mubr.msk.f32.gmra.mxu1 %vm361_vm7, %v652_v55  ;;  %1026 = vmatprep.subr.mxu1 %v1178_v0 }
 0x25c   : > { %v653_v58 = vrot.slane %v623_v57, 7  ;;  %1019 = vmatprep.mubr.msk.f32.mxu1 %vm1182_vm15, %v1178_v0  ;;  %1027 = vmatpush3.msra.mxu1 %v764_v1 }
 0x25d   : > { %1028 = vmatprep.subr.mxu1 %v1178_v0 }
 0x25e   : > { %v654_v60 = vsel %vm647_vm0, %v651_v52, %v653_v58  ;;  %1029 = vmatpush3.msra.mxu1 %v763_v3 }
 0x25f   : > { %1020 = vmatmul.mubr.msk.f32.gmra.mxu1 %vm361_vm7, %v654_v60  ;;  %1030 = vmatprep.subr.mxu1 %v1178_v0 }
 0x260   : > { %1038 = vmatprep.mubr.msk.f32.mxu1 %vm1182_vm15, %v1178_v0  ;;  %1031 = vmatpush3.msra.mxu1 %v762_v4 }
 0x261   : > { %1032 = vmatprep.subr.mxu1 %v1178_v0 }
 0x262   : > { %1033 = vmatpush3.msra.mxu1 %v761_v6 }
 0x263   : > { %1034 = vmatprep.subr.mxu1 %v1178_v0 }
 0x264   : > { %1035 = vmatpush3.msra.mxu1 %v760_v11 }
 0x265   : > { %1036 = vmatprep.subr.mxu1 %v1178_v0 }
 0x266   : > { %1037 = vmatpush3.msra.mxu1 %v759_v12 }
 0x317   : > { %v727_v14 = vpop.f32.mrf.mxu1 }
 0x318   : > { %v728_v15 = vadd.f32 %v951_v13, %v727_v14 }
 0x319   : > { %v1015_v16 = vpop.f32.mrf.mxu1 }
 0x31a   : > { %v741_v17 = vmax.f32 %v728_v15, 0.0 }
 0x31b   : > { %v732_v18 = vpop.f32.mrf.mxu1 }
 0x31c   : > { %v733_v19 = vadd.f32 %v951_v13, %v732_v18  ;;  %747 = vrot.lane.b32.xlu0 %v741_v17, %s1179_s18 }
 0x31d   : > { %v1018_v20 = vpop.f32.mrf.mxu1 }
 0x31e   : > { %v742_v7 = vmax.f32 %v733_v19, 0.0 }
 0x31f   : > { %v737_v21 = vpop.f32.mrf.mxu1 }
 0x320   : > { %v738_v22 = vadd.f32 %v951_v13, %v737_v21  ;;  %749 = vrot.lane.b32.xlu1 %v742_v7, %s1179_s18 }
 0x321   : > { %v1021_v23 = vpop.f32.mrf.mxu1 }
 0x322   : > { %v743_v8 = vmax.f32 %v738_v22, 0.0 }
 0x324   : > { %751 = vrot.lane.b32.xlu0 %v743_v8, %s1179_s18  ;;  %s269_s18 = sand.u32 1, %s1168_s25  }
 0x325   : > { %s1047_s17 = smul.u32 24, %s269_s18  ;;  %s1613_s13 = scalar_lea.sflag [#allocation3], %s269_s18 }
 0x327   : > { %s271_s23 = scalar_lea.vmem [#allocation2], %s1047_s17 }
 0x328   : > { %s880_s8 = sshll.u32 %s271_s23, 4  ;;  %s1606_s8 = int_to_ptr.vmem [resolvable:$true] %s880_s8 }
 0x329   : > { %s1116_s28 = scalar_lea.vmem %s1606_s8, 384  ;;  %p1123_p0 = scmp.lt.s32.totalorder %s1606_s8, %s1121_s15 }
 0x32a   : > { %p1117_p11 = scmp.ne.s32.totalorder %s1606_s8, %s1116_s28  ;;  %p1124_p1 = scmp.lt.s32.totalorder %s1122_s16, %s1116_s28 }
 0x32c   : > { %p1118_p12 = pnand %p1117_p11, %p1264_p5  ;;  %p1125_p2 = por %p1124_p1, %p1123_p0 }
 0x32e   : > { %p1119_p13 = pneg %p1118_p12 }
 0x330   : > { %p1126_p3 = pnand %p1125_p2, %p1119_p13 }
 0x38e   : > { %v748_v24 = vpop.permute.xlu0 %747 }
 0x38f   : > { %v756_v25 = vsel %vm351_vm5, %v501_v59, %v748_v24  ;;  %v955_v59 = vld [vmem:[%s1659_s6] ss:$0 sm:$0xff] }
 0x390   : > { %1039 = vmatmul.mubr.msk.f32.vlgmr.msra.gmra.mxu1 %vm356_vm6, %v756_v25 }
 0x391   : > { %1041 = vmatprep.mubr.msk.f32.mxu1 %vm1182_vm15, %v1178_v0 }
 0x392   : > { %v750_v26 = vpop.permute.xlu1 %749 }
 0x393   : > { %v757_v27 = vsel %vm351_vm5, %v502_v2, %v750_v26 }
 0x394   : > { %1042 = vmatmul.mubr.msk.f32.gmra.mxu1 %vm356_vm6, %v757_v27 }
 0x395   : > { %1044 = vmatprep.mubr.msk.f32.mxu1 %vm1182_vm15, %v1178_v0 }
 0x396   : > { %v752_v28 = vpop.permute.xlu0 %751 }
 0x397   : > { %v758_v56 = vsel %vm351_vm5, %v503_v10, %v752_v28 }
 0x398   : > { %1045 = vmatmul.mubr.msk.f32.gmra.mxu1 %vm356_vm6, %v758_v56 }
 0x450   : > { %v849_v61 = vpop.f32.mrf.mxu1 }
 0x451   : > { %v850_v2 = vadd.f32 %v955_v59, %v849_v61 }
 0x452   : > { %v1040_v29 = vpop.f32.mrf.mxu1 }
 0x453   : > { %863 = vst [vmem:[%s271_s23] sm:$0xff] %v850_v2 }
 0x454   : > { %v854_v0 = vpop.f32.mrf.mxu1 }
 0x455   : > { %v855_v5 = vadd.f32 %v955_v59, %v854_v0 }
 0x456   : > { %v1043_v30 = vpop.f32.mrf.mxu1 }
 0x457   : > { %864 = vst [vmem:[%s271_s23 + $0x8] sm:$0xff] %v855_v5 }
 0x458   : > { %v859_v10 = vpop.f32.mrf.mxu1 }
 0x459   : > { %v860_v31 = vadd.f32 %v955_v59, %v859_v10 }
 0x45a   : > { %v1046_v32 = vpop.f32.mrf.mxu1 }
 0x45b   : > { %865 = vst [vmem:[%s271_s23 + $0x10] sm:$0xff] %v860_v31 }
 0x45c   : > { %1129 = shalt.err (!%p1126_p3)
}
 0x45d   : > { %s1130_s18 = scalar_lea.hbm %s1611_s22, 384  ;;  %s1134_s21 = scalar_lea.hbm %s1660_s7, 768 }
 0x45e   : > { %p1131_p4 = scmp.ne.s32.totalorder %s1611_s22, %s1130_s18  ;;  %p1135_p9 = scmp.lt.s32.totalorder %s1611_s22, %s1660_s7 }
 0x45f   : > { %p1136_p10 = scmp.lt.s32.totalorder %s1134_s21, %s1130_s18 }
 0x460   : > { %p1132_p7 = pnand %p1131_p4, %p1264_p5 }
 0x461   : > { %p1137_p11 = por %p1136_p10, %p1135_p9 }
 0x462   : > { %p1133_p8 = pneg %p1132_p7 }
 0x464   : > { %p1138_p12 = pnand %p1137_p11, %p1133_p8 }
 0x466   : > { %1141 = shalt.err (!%p1138_p12)
}
 0x467   : > { %s1184_s19 = smov 128   ;;  %s1185_s9 = smov 8  }
 0x468   : > { %1055 = dma.vmem_to_hbm [thread:$0]  (%p1264_p5), %s1606_s8, 384, %s1611_s22, %s1613_s13, %s1184_s19, %s1184_s19, %s1185_s9  }
 0x469 PF: > { %p1061_p13 = scmp.ge.s32.totalorder %s1176_s27, 2  ;;  %s895_s28 = sand.u32 1, %s1164_s24  }
 0x46a   : > { %s896_s14 = scalar_lea.sflag [#allocation3], %s895_s28 }
 0x46b   : > { %p1058_p0 = pnand %p1061_p13, %p1268_p6 }
 0x46d   : > { %p1059_p1 = pneg %p1058_p0 }
 0x46f   : > { %1159 = dma.done.wait (%p1059_p1), %s896_s14, 384  }
 0x470   : > { %1161 = vsyncadd (%p1059_p1), %s896_s14, 4294966912  ;;  %p17_p2 = scmp.ge.s32.totalorder %s1251_s30, 4   ;;  %s1663_s24 = smov %s1168_s25 }
 0x471   : > { %s1664_s25 = smov %s1172_s26  ;;  %s1665_s26 = smov %s1262_s10 }
 0x472   : > { %s1666_s27 = smov %s1251_s30  ;;  %19 = sbr.rel (!%p17_p2) target bundleno = 3 (0x3), region = 83 }
 0x477   :  { %901 = vsyncpa [#allocation3], 1 }
 0x478   :  { %903 = vsyncpa [#allocation3 + $0x1], 1 }

</bundles_post_ra>
